<compile_context>
chip_gen: v7x
topology: tpu7x:2x2x1
jax: 0.10.0
libtpu: 0.0.40
codegen_flags: <defaults>
</compile_context>

<pallas_src>
import functools
import math

import jax
import jax.numpy as jnp
from jax import lax
from jax.experimental import pallas as pl
from jax.experimental.pallas import tpu as pltpu


# ------------------------------- kernel ------------------------------------ #

def _relu(x):
    return jnp.maximum(x, 0.0)


def _softplus(x):
    # numerically stable softplus = log(1 + exp(x))
    return jnp.maximum(x, 0.0) + jnp.log1p(jnp.exp(-jnp.abs(x)))


def mlp_kernel(*refs, num_hidden, evidential, out_dim):
    """Fused MLP forward.

    refs = (x_ref, w1, b1, ..., wH, bH, w_head, b_head, out_ref).
    x and weights arrive as bf16 (MXU operands); biases and all elementwise
    math are f32.  Accumulation is f32 via preferred_element_type.
    """
    x_ref, out_ref = refs[0], refs[-1]
    wb = refs[1:-1]

    h = x_ref[...]                                  # bf16 activations for MXU
    for l in range(num_hidden):
        w = wb[2 * l][...]
        b = wb[2 * l + 1][...]
        h = _relu(jnp.dot(h, w, preferred_element_type=jnp.float32) + b)
        h = h.astype(jnp.bfloat16)                  # operand for next matmul

    w_head = wb[2 * num_hidden][...]
    b_head = wb[2 * num_hidden + 1][...]
    z = jnp.dot(h, w_head, preferred_element_type=jnp.float32) + b_head

    if evidential:
        sp = _softplus(z)
        # packed head columns: [mu | v | alpha | beta], each `out_dim` wide
        head_id = lax.broadcasted_iota(jnp.int32, z.shape, 1) // out_dim
        z = jnp.where(head_id == 0, z,
                      jnp.where(head_id == 2, sp + 1.0, sp + 1e-6))

    out_ref[...] = z.astype(out_ref.dtype)


# --------------------------- parameter init --------------------------------- #

def kaiming_linear(key, in_dim, out_dim):
    """PyTorch nn.init.kaiming_normal_ default (fan_in, gain=sqrt(2)); bias=0.
    Weight is stored (in_dim, out_dim) so the kernel computes x @ W."""
    std = math.sqrt(2.0) / math.sqrt(in_dim)
    w = jax.random.normal(key, (in_dim, out_dim), dtype=jnp.float32) * std
    b = jnp.zeros((1, out_dim), dtype=jnp.float32)
    return w, b


def init_generic_regressor(key, input_dim, hidden_dims, output_dim,
                           output_type="regression"):
    keys = jax.random.split(key, len(hidden_dims) + 4)
    params = {}
    prev = input_dim
    for i, h in enumerate(hidden_dims):
        params[f"w{i+1}"], params[f"b{i+1}"] = kaiming_linear(keys[i], prev, h)
        prev = h
    if output_type == "regression":
        params["wo"], params["bo"] = kaiming_linear(
            keys[len(hidden_dims)], prev, output_dim)
    else:  # evidential
        for j, name in enumerate(["mu", "v", "a", "b"]):
            params[f"w_{name}"], params[f"b_{name}"] = kaiming_linear(
                keys[len(hidden_dims) + j], prev, output_dim)
    return params


def _num_hidden(params):
    return sum(1 for k in params if k.startswith("w") and k[1:].isdigit())


# ------------------------------ wrappers ------------------------------------ #

def _pallas_mlp_call(kernel, x, weights_and_biases, out_dim_total,
                     *, transcendental_ops=0, batch_tile=512):
    """Single fused pallas_call over a batch grid with resident weights."""
    B, input_dim = x.shape
    tb = B if B <= batch_tile else batch_tile        # tile is a mult. of 8 when tiling
    pad = (-B) % tb
    xp = jnp.pad(x, ((0, pad), (0, 0))) if pad else x
    Bp = xp.shape[0]
    grid = (Bp // tb,)

    xp = xp.astype(jnp.bfloat16)                     # halve x DMA bytes (MXU operand)

    in_specs = [pl.BlockSpec((tb, input_dim), lambda i: (i, 0))]
    args = [xp]
    flops_k = 0
    bytes_accessed = xp.size * xp.dtype.itemsize
    prev = input_dim
    for (w, b) in weights_and_biases:
        # constant index_map -> weights/biases stay resident in VMEM
        in_specs.append(pl.BlockSpec(w.shape, lambda i: (0, 0)))
        in_specs.append(pl.BlockSpec(b.shape, lambda i: (0, 0)))
        args += [w, b]
        flops_k += prev * w.shape[1]
        bytes_accessed += w.size * w.dtype.itemsize + b.size * b.dtype.itemsize
        prev = w.shape[1]
    bytes_accessed += Bp * out_dim_total * 4

    y = pl.pallas_call(
        kernel,
        out_shape=jax.ShapeDtypeStruct((Bp, out_dim_total), jnp.float32),
        grid=grid,
        in_specs=in_specs,
        out_specs=pl.BlockSpec((tb, out_dim_total), lambda i: (i, 0)),
        compiler_params=pltpu.CompilerParams(
            dimension_semantics=("parallel",)),      # megacore sharding on v7x
        cost_estimate=pl.CostEstimate(
            flops=int(2 * Bp * flops_k),
            transcendentals=int(transcendental_ops),
            bytes_accessed=int(bytes_accessed)),
    )(*args)

    return y[:B] if pad else y


def generic_regressor_regression(x, params, *, batch_tile=512):
    n_hidden = _num_hidden(params)
    out_dim = params["wo"].shape[1]
    wb = [(params[f"w{i+1}"].astype(jnp.bfloat16), params[f"b{i+1}"])
          for i in range(n_hidden)]
    wb.append((params["wo"].astype(jnp.bfloat16), params["bo"]))
    kernel = functools.partial(mlp_kernel, num_hidden=n_hidden,
                               evidential=False, out_dim=out_dim)
    return _pallas_mlp_call(kernel, x, wb, out_dim, batch_tile=batch_tile)


def generic_regressor_evidential(x, params, *, batch_tile=512):
    n_hidden = _num_hidden(params)
    out_dim = params["w_mu"].shape[1]
    wb = [(params[f"w{i+1}"].astype(jnp.bfloat16), params[f"b{i+1}"])
          for i in range(n_hidden)]
    # pack the 4 heads -> single (hidden, 4*out_dim) matmul, single lane-packed store
    w_head = jnp.concatenate(
        [params["w_mu"], params["w_v"], params["w_a"], params["w_b"]],
        axis=1).astype(jnp.bfloat16)
    b_head = jnp.concatenate(
        [params["b_mu"], params["b_v"], params["b_a"], params["b_b"]], axis=1)
    wb.append((w_head, b_head))
    kernel = functools.partial(mlp_kernel, num_hidden=n_hidden,
                               evidential=True, out_dim=out_dim)
    packed = _pallas_mlp_call(kernel, x, wb, 4 * out_dim,
                              transcendental_ops=2 * x.shape[0] * 4 * out_dim,
                              batch_tile=batch_tile)
    mu = packed[:, 0 * out_dim:1 * out_dim]
    v = packed[:, 1 * out_dim:2 * out_dim]
    alpha = packed[:, 2 * out_dim:3 * out_dim]
    beta = packed[:, 3 * out_dim:4 * out_dim]
    return mu, v, alpha, beta


# ------------------------------ references ---------------------------------- #

def _bdot(a, w):
    # emulate the kernel's bf16-operand / f32-accumulate matmul
    return jnp.dot(a.astype(jnp.bfloat16), w.astype(jnp.bfloat16),
                   preferred_element_type=jnp.float32)


def _ref_hidden(x, p, n_hidden, dot):
    h = x
    for i in range(n_hidden):
        h = jnp.maximum(dot(h, p[f"w{i+1}"]) + p[f"b{i+1}"], 0.0)
    return h


def ref_regression(x, p, dot):
    h = _ref_hidden(x, p, _num_hidden(p), dot)
    return dot(h, p["wo"]) + p["bo"]


def ref_evidential(x, p, dot):
    h = _ref_hidden(x, p, _num_hidden(p), dot)
    mu = dot(h, p["w_mu"]) + p["b_mu"]
    v = jax.nn.softplus(dot(h, p["w_v"]) + p["b_v"]) + 1e-6
    a = jax.nn.softplus(dot(h, p["w_a"]) + p["b_a"]) + 1.0
    b = jax.nn.softplus(dot(h, p["w_b"]) + p["b_b"]) + 1e-6
    return mu, v, a, b


_f32dot = lambda a, w: jnp.dot(a, w, preferred_element_type=jnp.float32)


# --------------------------------- main -------------------------------------- #

if __name__ == "__main__":
    key = jax.random.PRNGKey(0)
    k_x, k_p1, k_p2 = jax.random.split(key, 3)

    batch, input_dim, hidden_dims, output_dim = 8, 32, [64, 64], 1
    x = jax.random.normal(k_x, (batch, input_dim), dtype=jnp.float32)

    # --- regression head (module default: output_type='regression') ---
    p_reg = init_generic_regressor(k_p1, input_dim, hidden_dims, output_dim,
                                   output_type="regression")
    y = generic_regressor_regression(x, p_reg)
    jax.block_until_ready(y)
    assert y.shape == (batch, output_dim)
    # tight check vs bf16-matmul reference (what the kernel computes)
    y_bf = ref_regression(x, p_reg, _bdot)
    assert jnp.allclose(y, y_bf, atol=2e-3, rtol=2e-3), "regression (bf16 ref) mismatch"
    # loose check vs full-f32 reference (module semantics)
    y_f32 = ref_regression(x, p_reg, _f32dot)
    assert jnp.allclose(y, y_f32, atol=1e-1, rtol=1e-1), "regression (f32 ref) mismatch"

    # --- evidential head (output_type='evidential') ---
    p_ev = init_generic_regressor(k_p2, input_dim, hidden_dims, output_dim,
                                  output_type="evidential")
    mu, v, alpha, beta = generic_regressor_evidential(x, p_ev)
    jax.block_until_ready((mu, v, alpha, beta))
    mu_b, v_b, a_b, b_b = ref_evidential(x, p_ev, _bdot)
    for got, ref in ((mu, mu_b), (v, v_b), (alpha, a_b), (beta, b_b)):
        assert got.shape == (batch, output_dim)
        assert jnp.allclose(got, ref, atol=2e-3, rtol=2e-3), "evidential (bf16 ref) mismatch"
    mu_f, v_f, a_f, b_f = ref_evidential(x, p_ev, _f32dot)
    for got, ref in ((mu, mu_f), (v, v_f), (alpha, a_f), (beta, b_f)):
        assert jnp.allclose(got, ref, atol=1e-1, rtol=1e-1), "evidential (f32 ref) mismatch"

    print("KERNEL_OK")
</pallas_src>

<mosaic_0001>
module attributes {stable_mosaic.version = 11 : i64} {
  func.func @mlp_kernel(%arg0: i32, %arg1: memref<8x32xbf16, #tpu.memory_space<vmem>>, %arg2: memref<32x64xbf16, #tpu.memory_space<vmem>>, %arg3: memref<1x64xf32, #tpu.memory_space<vmem>>, %arg4: memref<64x64xbf16, #tpu.memory_space<vmem>>, %arg5: memref<1x64xf32, #tpu.memory_space<vmem>>, %arg6: memref<64x1xbf16, #tpu.memory_space<vmem>>, %arg7: memref<1x1xf32, #tpu.memory_space<vmem>>, %arg8: memref<8x1xf32, #tpu.memory_space<vmem>>) attributes {dimension_semantics = [#tpu.dimension_semantics<parallel>], iteration_bounds = array<i64: 1>, scalar_prefetch = 0 : i64, scratch_operands = 0 : i64, tpu.core_type = #tpu.core_type<tc>, window_params = [{transform_indices = @transform_0, window_bounds = array<i64: 8, 32>}, {pipeline_mode = #tpu.pipeline_mode<synchronous>, transform_indices = @transform_1, window_bounds = array<i64: 32, 64>}, {pipeline_mode = #tpu.pipeline_mode<synchronous>, transform_indices = @transform_2, window_bounds = array<i64: 1, 64>}, {pipeline_mode = #tpu.pipeline_mode<synchronous>, transform_indices = @transform_3, window_bounds = array<i64: 64, 64>}, {pipeline_mode = #tpu.pipeline_mode<synchronous>, transform_indices = @transform_4, window_bounds = array<i64: 1, 64>}, {pipeline_mode = #tpu.pipeline_mode<synchronous>, transform_indices = @transform_5, window_bounds = array<i64: 64, 1>}, {pipeline_mode = #tpu.pipeline_mode<synchronous>, transform_indices = @transform_6, window_bounds = array<i64: 1, 1>}, {transform_indices = @transform_7, window_bounds = array<i64: 8, 1>}]} {
    %c0 = arith.constant 0 : index
    %c0_0 = arith.constant 0 : index
    %0 = vector.load %arg1[%c0, %c0_0] : memref<8x32xbf16, #tpu.memory_space<vmem>>, vector<8x32xbf16>
    %c0_1 = arith.constant 0 : index
    %c0_2 = arith.constant 0 : index
    %1 = vector.load %arg2[%c0_1, %c0_2] : memref<32x64xbf16, #tpu.memory_space<vmem>>, vector<32x64xbf16>
    %c0_3 = arith.constant 0 : index
    %c0_4 = arith.constant 0 : index
    %2 = vector.load %arg3[%c0_3, %c0_4] : memref<1x64xf32, #tpu.memory_space<vmem>>, vector<1x64xf32>
    %cst = arith.constant dense<0.000000e+00> : vector<8x64xf32>
    %3 = tpu.matmul %0, %1, %cst {dimension_numbers = #tpu.dot_dimension_numbers<[1], [0], [0], [1], [0, 0, 1, 1], [], []>} : vector<8x32xbf16>, vector<32x64xbf16>, vector<8x64xf32> -> vector<8x64xf32>
    %4 = vector.broadcast %2 : vector<1x64xf32> to vector<8x64xf32>
    %5 = arith.addf %3, %4 : vector<8x64xf32>
    %cst_5 = arith.constant 0.000000e+00 : f32
    %6 = vector.broadcast %cst_5 : f32 to vector<8x64xf32>
    %7 = arith.maximumf %5, %6 : vector<8x64xf32>
    %8 = arith.truncf %7 : vector<8x64xf32> to vector<8x64xbf16>
    %c0_6 = arith.constant 0 : index
    %c0_7 = arith.constant 0 : index
    %9 = vector.load %arg4[%c0_6, %c0_7] : memref<64x64xbf16, #tpu.memory_space<vmem>>, vector<64x64xbf16>
    %c0_8 = arith.constant 0 : index
    %c0_9 = arith.constant 0 : index
    %10 = vector.load %arg5[%c0_8, %c0_9] : memref<1x64xf32, #tpu.memory_space<vmem>>, vector<1x64xf32>
    %cst_10 = arith.constant dense<0.000000e+00> : vector<8x64xf32>
    %11 = tpu.matmul %8, %9, %cst_10 {dimension_numbers = #tpu.dot_dimension_numbers<[1], [0], [0], [1], [0, 0, 1, 1], [], []>} : vector<8x64xbf16>, vector<64x64xbf16>, vector<8x64xf32> -> vector<8x64xf32>
    %12 = vector.broadcast %10 : vector<1x64xf32> to vector<8x64xf32>
    %13 = arith.addf %11, %12 : vector<8x64xf32>
    %cst_11 = arith.constant 0.000000e+00 : f32
    %14 = vector.broadcast %cst_11 : f32 to vector<8x64xf32>
    %15 = arith.maximumf %13, %14 : vector<8x64xf32>
    %16 = arith.truncf %15 : vector<8x64xf32> to vector<8x64xbf16>
    %c0_12 = arith.constant 0 : index
    %c0_13 = arith.constant 0 : index
    %17 = vector.load %arg6[%c0_12, %c0_13] : memref<64x1xbf16, #tpu.memory_space<vmem>>, vector<64x1xbf16>
    %c0_14 = arith.constant 0 : index
    %c0_15 = arith.constant 0 : index
    %18 = vector.load %arg7[%c0_14, %c0_15] : memref<1x1xf32, #tpu.memory_space<vmem>>, vector<1x1xf32>
    %cst_16 = arith.constant dense<0.000000e+00> : vector<8x1xf32>
    %19 = tpu.matmul %16, %17, %cst_16 {dimension_numbers = #tpu.dot_dimension_numbers<[1], [0], [0], [1], [0, 0, 1, 1], [], []>} : vector<8x64xbf16>, vector<64x1xbf16>, vector<8x1xf32> -> vector<8x1xf32>
    %20 = vector.broadcast %18 : vector<1x1xf32> to vector<8x1xf32>
    %21 = arith.addf %19, %20 : vector<8x1xf32>
    %c0_17 = arith.constant 0 : index
    %c0_18 = arith.constant 0 : index
    %22 = vector.load %arg8[%c0_17, %c0_18] : memref<8x1xf32, #tpu.memory_space<vmem>>, vector<8x1xf32>
    tpu.vector_store %arg8[%c0_17, %c0_18], %21 {strides = array<i32>} : memref<8x1xf32, #tpu.memory_space<vmem>>, vector<8x1xf32>,
    return
  }
  func.func @transform_0(%arg0: i32) -> (i32, i32) {
    %c0_i32 = arith.constant 0 : i32
    %c0_i32_0 = arith.constant 0 : i32
    return %arg0, %c0_i32 : i32, i32
  }
  func.func @transform_1(%arg0: i32) -> (i32, i32) {
    %c0_i32 = arith.constant 0 : i32
    %c0_i32_0 = arith.constant 0 : i32
    %c0_i32_1 = arith.constant 0 : i32
    return %c0_i32, %c0_i32_0 : i32, i32
  }
  func.func @transform_2(%arg0: i32) -> (i32, i32) {
    %c0_i32 = arith.constant 0 : i32
    %c0_i32_0 = arith.constant 0 : i32
    %c0_i32_1 = arith.constant 0 : i32
    return %c0_i32, %c0_i32_0 : i32, i32
  }
  func.func @transform_3(%arg0: i32) -> (i32, i32) {
    %c0_i32 = arith.constant 0 : i32
    %c0_i32_0 = arith.constant 0 : i32
    %c0_i32_1 = arith.constant 0 : i32
    return %c0_i32, %c0_i32_0 : i32, i32
  }
  func.func @transform_4(%arg0: i32) -> (i32, i32) {
    %c0_i32 = arith.constant 0 : i32
    %c0_i32_0 = arith.constant 0 : i32
    %c0_i32_1 = arith.constant 0 : i32
    return %c0_i32, %c0_i32_0 : i32, i32
  }
  func.func @transform_5(%arg0: i32) -> (i32, i32) {
    %c0_i32 = arith.constant 0 : i32
    %c0_i32_0 = arith.constant 0 : i32
    %c0_i32_1 = arith.constant 0 : i32
    return %c0_i32, %c0_i32_0 : i32, i32
  }
  func.func @transform_6(%arg0: i32) -> (i32, i32) {
    %c0_i32 = arith.constant 0 : i32
    %c0_i32_0 = arith.constant 0 : i32
    %c0_i32_1 = arith.constant 0 : i32
    return %c0_i32, %c0_i32_0 : i32, i32
  }
  func.func @transform_7(%arg0: i32) -> (i32, i32) {
    %c0_i32 = arith.constant 0 : i32
    %c0_i32_0 = arith.constant 0 : i32
    return %arg0, %c0_i32 : i32, i32
  }
}

</mosaic_0001>

<bundles_post_ra>
// kernel: tpu_custom_call.1
= control target key start
LH: loop header
LB: loop body
LE: loop exit
PB: predicated region body
PF: predicated region fallthrough
CT: control target
= control target key end

     0   :  { %s533_s0 = inlined_call_operand.hbm [shape: bf16[8,32], index: 0, kind: input, shape index: {}]   ;;  %s534_s1 = inlined_call_operand.vmem [shape: bf16[32,64], index: 1, kind: input, shape index: {}]   ;;  %s535_s2 = inlined_call_operand.hbm [shape: f32[1,64], index: 2, kind: input, shape index: {}]   ;;  %s536_s3 = inlined_call_operand.vmem [shape: bf16[64,64], index: 3, kind: input, shape index: {}]   ;;  %s537_s4 = inlined_call_operand.vmem [shape: f32[1,64], index: 4, kind: input, shape index: {}]   ;;  %s538_s5 = inlined_call_operand.vmem [shape: bf16[64,1], index: 5, kind: input, shape index: {}]   ;;  %s539_s6 = inlined_call_operand.<no memory space> [shape: f32[1,1], index: 6, kind: input, shape index: {}]   ;;  %s540_s7 = inlined_call_operand.vmem [shape: f32[8,1], index: 7, kind: output, shape index: {}]  }
   0x1   :  { %v12_v0 = vstv %s539_s6 }
   0x2   :  { %13 = vst [vmem:[#allocation2] sm:$0x1] %v12_v0 }
   0x3   :  { %14 = vsyncpa [#allocation4], 0 }
   0x4   :  { %15 = vsyncpa [#allocation6], 0  ;;  %s421_s26 = smov [#allocation3]   ;;  %s422_s28 = smov [#allocation5]  }
   0x5   :  { %s22_s27 = sshll.u32 %s421_s26, 4  ;;  %s34_s29 = sshll.u32 %s422_s28, 4  ;;  %s23_s27 = int_to_ptr.vmem [resolvable:$true] %s22_s27  ;;  %s35_s29 = int_to_ptr.vmem [resolvable:$true] %s34_s29 }
   0x6   :  { %s373_s9 = scalar_lea.hbm %s533_s0, 64 }
   0x7   :  { %p374_p0 = scmp.ne.s32.totalorder %s533_s0, %s373_s9  ;;  %p377_p1 = scmp.lt.u32.totalorder %s373_s9, %s533_s0 }
   0x9   :  { %p379_p2 = pnand %p377_p1, %p374_p0 }
   0xb   :  { %382 = shalt.err (!%p379_p2)
}
   0xc   :  { %s383_s6 = scalar_lea.vmem %s23_s27, 64  ;;  %p388_p4 = scmp.lt.s32.totalorder %s23_s27, %s23_s27 }
   0xd   :  { %p384_p3 = scmp.ne.s32.totalorder %s23_s27, %s383_s6  ;;  %p389_p5 = scmp.lt.s32.totalorder %s383_s6, %s383_s6 }
   0xf   :  { %p390_p6 = por %p389_p5, %p388_p4 }
  0x11   :  { %p391_p7 = pnand %p390_p6, %p384_p3 }
  0x13   :  { %394 = shalt.err (!%p391_p7)
}
  0x14   :  { %25 = dma.hbm_to_vmem [thread:$0]  %s533_s0, 64, %s23_s27, [#allocation4]  }
  0x15   :  { %s395_s18 = scalar_lea.hbm %s535_s2, 16 }
  0x16   :  { %p396_p8 = scmp.ne.s32.totalorder %s535_s2, %s395_s18  ;;  %p399_p9 = scmp.lt.u32.totalorder %s395_s18, %s535_s2 }
  0x18   :  { %p401_p10 = pnand %p399_p9, %p396_p8 }
  0x1a   :  { %404 = shalt.err (!%p401_p10)
}
  0x1b   :  { %s405_s23 = scalar_lea.vmem %s35_s29, 16  ;;  %s409_s24 = scalar_lea.vmem %s35_s29, 32 }
  0x1c   :  { %p406_p11 = scmp.ne.s32.totalorder %s35_s29, %s405_s23  ;;  %p410_p12 = scmp.lt.s32.totalorder %s35_s29, %s35_s29 }
  0x1d   :  { %p411_p13 = scmp.lt.s32.totalorder %s409_s24, %s405_s23 }
  0x1f   :  { %p412_p0 = por %p411_p13, %p410_p12 }
  0x21   :  { %p413_p1 = pnand %p412_p0, %p406_p11 }
  0x23   :  { %416 = shalt.err (!%p413_p1)
}
  0x24   :  { %37 = dma.hbm_to_vmem [thread:$0]  %s535_s2, 16, %s35_s29, [#allocation6]  }
  0x25   :  { %417 = dma.done.wait [#allocation4], 64  }
  0x26   :  { %418 = vsyncadd [#allocation4], 4294967232 }
  0x27   :  { %419 = dma.done.wait [#allocation6], 16  }
  0x28   :  { %420 = vsyncadd [#allocation6], 4294967280  ;;  %v423_v1 = vmov 0.0   ;;  %vm424_vm0 = vmmov 0   ;;  %v363_v2 = vld [vmem:[%s534_s1] sm:$0xff]   ;;  %v364_v3 = vld [vmem:[%s534_s1 + $0x8] sm:$0xff]  }
  0x29   :  { %327 = vmatprep.subr.bf16.mxu0 %v423_v1  ;;  %331 = vmatprep.mubr.msk.bf16.mxu0 %vm424_vm0, %v423_v1  ;;  %v365_v4 = vld [vmem:[%s536_s3] sm:$0xff]   ;;  %vm77_vm1 = vcmask 261120   ;;  %v366_v6 = vld [vmem:[%s536_s3 + $0x8] sm:$0xff]   ;;  %v367_v7 = vld [vmem:[%s536_s3 + $0x10] sm:$0xff]   ;;  %vm162_vm2 = vcmask 523264   ;;  %vm290_vm3 = vcmask 7168  }
  0x2a   :  { %335 = vmatprep.subr.bf16.mxu1 %v423_v1  ;;  %343 = vmatprep.mubr.msk.bf16.mxu1 %vm424_vm0, %v423_v1  ;;  %v53_v5 = vld [vmem:[#allocation3] sm:$0xf]  ;;  %v368_v8 = vld [vmem:[%s536_s3 + $0x18] sm:$0xff]   ;;  %v370_v10 = vld [vmem:[%s538_s5 + $0x8] sm:$0xff]  }
  0x2b   :  { %328 = vmatpush3.bf16.msra.mxu0 %v363_v2  ;;  %336 = vmatpush3.bf16.msra.mxu1 %v365_v4  ;;  %v369_v9 = vld [vmem:[%s538_s5] sm:$0xff]   ;;  %v371_v19 = vld [vmem:[%s538_s5 + $0x10] sm:$0xff]   ;;  %v372_v20 = vld [vmem:[%s538_s5 + $0x18] sm:$0xff]  }
  0x2c   :  { %329 = vmatprep.subr.bf16.mxu0 %v423_v1  ;;  %337 = vmatprep.subr.bf16.mxu1 %v423_v1  ;;  %v298_v11 = vld [vmem:[#allocation5] ss:$0 sm:$0xff]  ;;  %v302_v21 = vld [vmem:[%s537_s4] ss:$0 sm:$0xff] }
  0x2d   :  { %v308_v29 = vld [vmem:[#allocation2] ss:$0 sm:$0xff] }
  0x2f   :  { %330 = vmatpush3.bf16.msra.mxu0 %v364_v3  ;;  %338 = vmatpush3.bf16.msra.mxu1 %v366_v6 }
  0x30   :  { %347 = vmatprep.subr.bf16.mxu0 %v423_v1  ;;  %339 = vmatprep.subr.bf16.mxu1 %v423_v1 }
  0x32   :  { %332 = vmatmul.mubr.msk.bf16.vlgmr.msra.gmra.mrb[0].mxu0 %vm77_vm1, %v53_v5 }
  0x33   :  { %355 = vmatprep.mubr.msk.bf16.mxu0 %vm424_vm0, %v423_v1  ;;  %340 = vmatpush3.bf16.msra.mxu1 %v367_v7 }
  0x34   :  { %341 = vmatprep.subr.bf16.mxu1 %v423_v1  ;;  %348 = vmatpush3.bf16.msra.mxu0 %v369_v9 }
  0x35   :  { %349 = vmatprep.subr.bf16.mxu0 %v423_v1 }
  0x37   :  { %342 = vmatpush3.bf16.msra.mxu1 %v368_v8 }
  0x38   :  { %350 = vmatpush3.bf16.msra.mxu0 %v370_v10 }
  0x39   :  { %351 = vmatprep.subr.bf16.mxu0 %v423_v1 }
  0x3c   :  { %352 = vmatpush3.bf16.msra.mxu0 %v371_v19 }
  0x3d   :  { %353 = vmatprep.subr.bf16.mxu0 %v423_v1 }
  0x40   :  { %354 = vmatpush3.bf16.msra.mxu0 %v372_v20 }
 0x105   :  { %v115_v12 = vpop.f32.mrb[0].mxu0 }
 0x106   :  { %v116_v13 = vadd.f32 %v298_v11, %v115_v12  ;;  %v333_v14 = vpop.f32.mrb[1].mxu0 }
 0x107   :  { %v118_v15 = vpop.f32.mrb[2].mxu0 }
 0x108   :  { %v121_v16 = vmax.f32 %v116_v13, 0.0  ;;  %v334_v17 = vpop.f32.mrb[3].mxu0 }
 0x10a   :  { %v122_v18 = vpack.c.bf16 %v121_v16, %v121_v16 }
 0x10c   :  { %344 = vmatmul.mubr.msk.bf16.vlgmr.msra.gmra.mrb[0].mxu1 %vm162_vm2, %v122_v18 }
 0x1df   :  { %v200_v22 = vpop.f32.mrb[0].mxu1 }
 0x1e0   :  { %v201_v23 = vadd.f32 %v302_v21, %v200_v22  ;;  %v345_v24 = vpop.f32.mrb[1].mxu1 }
 0x1e1   :  { %v203_v25 = vpop.f32.mrb[2].mxu1 }
 0x1e2   :  { %v206_v26 = vmax.f32 %v201_v23, 0.0  ;;  %v346_v27 = vpop.f32.mrb[3].mxu1 }
 0x1e4   :  { %v207_v28 = vpack.c.bf16 %v206_v26, %v206_v26 }
 0x1e6   :  { %356 = vmatmul.mubr.msk.bf16.vlgmr.msra.gmra.mrb[4].mxu0 %vm162_vm2, %v207_v28 }
 0x2b9   :  { %v284_v30 = vpop.f32.mrb[4].mxu0 }
 0x2ba   :  { %v285_v31 = vadd.f32 %v308_v29, %v284_v30  ;;  %v357_v32 = vpop.f32.mrb[5].mxu0 }
 0x2bb   :  { %v287_v33 = vpop.f32.mrb[6].mxu0 }
 0x2bc   :  { %291 = vst.msk [vmem:[%s540_s7] sm:$0xff] %vm290_vm3, %v285_v31  ;;  %v358_v34 = vpop.f32.mrb[7].mxu0 }
 0x2bd   :  { %296 = vsyncpa [#allocation4], 1 }
 0x2be   :  { %297 = vsyncpa [#allocation6], 1 }

</bundles_post_ra>
